<compile_context>
chip_gen: v7x
topology: tpu7x:2x2x1
jax: 0.10.0
libtpu: 0.0.40
codegen_flags: <defaults>
</compile_context>

<pallas_src>
import jax
import jax.numpy as jnp
from jax.experimental import pallas as pl
from jax.experimental.pallas import tpu as pltpu


def _m3pa_kernel(x1_ref, x2_ref,
                 wa1_ref, ba1_ref, wa2_ref,
                 w1_ref, b1_ref, w2_ref, b2_ref,
                 o_ref):
    """Attention over the pair {x1, x2} + Linear -> ReLU -> Linear."""
    x1 = x1_ref[...]                                   # (TB, D)
    x2 = x2_ref[...]                                   # (TB, D)

    # --- attention scores: two small matmuls sharing wa1/ba1 --------------
    wa1 = wa1_ref[...]
    ba1 = ba1_ref[...]
    wa2 = wa2_ref[...]
    a1 = jnp.tanh(jnp.dot(x1, wa1, preferred_element_type=jnp.float32) + ba1)
    a2 = jnp.tanh(jnp.dot(x2, wa1, preferred_element_type=jnp.float32) + ba1)
    s1 = jnp.sum(a1 * wa2, axis=-1, keepdims=True)     # (TB, 1)
    s2 = jnp.sum(a2 * wa2, axis=-1, keepdims=True)     # (TB, 1)

    # softmax over the 2-element stack axis (dim=1 in the PyTorch module)
    m = jnp.maximum(s1, s2)
    e1 = jnp.exp(s1 - m)
    e2 = jnp.exp(s2 - m)
    inv = 1.0 / (e1 + e2)                              # exact; (TB,1) is tiny
    feat = (e1 * inv) * x1 + (e2 * inv) * x2           # (TB, D)

    # --- linear1 -> ReLU -> linear2 (natural O output columns) ------------
    h = jnp.dot(feat, w1_ref[...], preferred_element_type=jnp.float32) + b1_ref[...]
    h = jnp.maximum(h, 0.0)
    out = jnp.dot(h, w2_ref[...], preferred_element_type=jnp.float32) + b2_ref[...]
    o_ref[...] = out.astype(o_ref.dtype)               # (TB, O)


def m3pa_forward(x1, x2, params, *, block_rows=2048):
    """params: dict of already-transposed weights (see layout comment)."""
    B, D = x1.shape
    O = params["w2"].shape[1]

    # Batch tiling: TB rows per grid step (sublane multiple of 8); pad B so
    # the grid divides evenly (zero rows are harmless and sliced off below).
    TB = min(block_rows, max(8, ((B + 7) // 8) * 8))
    Bp = pl.cdiv(B, TB) * TB
    if Bp != B:
        x1 = jnp.pad(x1, ((0, Bp - B), (0, 0)))
        x2 = jnp.pad(x2, ((0, Bp - B), (0, 0)))

    row_spec = pl.BlockSpec((TB, D), lambda i: (i, 0))

    def const(shape):  # weights/biases: DMA'd once, stay VMEM-resident
        return pl.BlockSpec(shape, lambda i: (0, 0))

    out = pl.pallas_call(
        _m3pa_kernel,
        out_shape=jax.ShapeDtypeStruct((Bp, O), jnp.float32),
        grid=(Bp // TB,),
        in_specs=[row_spec, row_spec,
                  const(params["wa1"].shape), const(params["ba1"].shape),
                  const(params["wa2"].shape),
                  const(params["w1"].shape), const(params["b1"].shape),
                  const(params["w2"].shape), const(params["b2"].shape)],
        out_specs=pl.BlockSpec((TB, O), lambda i: (i, 0)),
        compiler_params=pltpu.CompilerParams(
            dimension_semantics=("parallel",)),
    )(x1, x2,
      params["wa1"], params["ba1"], params["wa2"],
      params["w1"], params["b1"], params["w2"], params["b2"])

    if Bp != B:
        out = out[:B]
    return out


def _reference(x1, x2, p):
    """Pure-JAX reference mirroring the PyTorch forward exactly."""
    z = jnp.stack([x1, x2], axis=1)                         # (B, 2, D)
    w = jnp.tanh(z @ p["wa1"] + p["ba1"][0])                # (B, 2, H)
    w = w @ p["wa2"][0][:, None]                            # (B, 2, 1)
    beta = jax.nn.softmax(w, axis=1)
    feat = jnp.sum(beta * z, axis=1)                        # (B, D)
    h = jnp.maximum(feat @ p["w1"] + p["b1"][0], 0.0)
    return h @ p["w2"] + p["b2"][0]


if __name__ == "__main__":
    # batch, inputSize, attention hidden, outputSize
    B, D, H, O = 128, 32, 32, 8

    key = jax.random.PRNGKey(0)
    ks = jax.random.split(key, 9)

    # deterministic synthetic parameters (PyTorch shapes, stored transposed)
    params = {
        "wa1": 0.1 * jax.random.normal(ks[0], (D, H), jnp.float32),  # attention.l1.weight^T
        "ba1": 0.1 * jax.random.normal(ks[1], (1, H), jnp.float32),  # attention.l1.bias
        "wa2": 0.1 * jax.random.normal(ks[2], (1, H), jnp.float32),  # attention.l2.weight
        "w1":  0.1 * jax.random.normal(ks[3], (D, D), jnp.float32),  # linear1.weight^T
        "b1":  0.1 * jax.random.normal(ks[4], (1, D), jnp.float32),  # linear1.bias
        "w2":  0.1 * jax.random.normal(ks[5], (D, O), jnp.float32),  # linear2.weight^T
        "b2":  0.1 * jax.random.normal(ks[6], (1, O), jnp.float32),  # linear2.bias
    }

    x1 = jax.random.normal(ks[7], (B, D), jnp.float32)
    x2 = jax.random.normal(ks[8], (B, D), jnp.float32)

    # block_rows=64 -> 2 grid steps at this small size, exercising the
    # batch-tiled pipeline; production sizes use the default 2048-row tiles.
    out = m3pa_forward(x1, x2, params, block_rows=64)
    out = jax.block_until_ready(out)

    ref = _reference(x1, x2, params)
    assert out.shape == (B, O)
    assert jnp.allclose(out, ref, atol=2e-3, rtol=2e-3), "mismatch vs reference"

    print("KERNEL_OK")
</pallas_src>

<mosaic_0001>
module attributes {stable_mosaic.version = 11 : i64} {
  func.func @_m3pa_kernel(%arg0: i32, %arg1: memref<64x32xf32, #tpu.memory_space<vmem>>, %arg2: memref<64x32xf32, #tpu.memory_space<vmem>>, %arg3: memref<32x32xf32, #tpu.memory_space<vmem>>, %arg4: memref<1x32xf32, #tpu.memory_space<vmem>>, %arg5: memref<1x32xf32, #tpu.memory_space<vmem>>, %arg6: memref<32x32xf32, #tpu.memory_space<vmem>>, %arg7: memref<1x32xf32, #tpu.memory_space<vmem>>, %arg8: memref<32x8xf32, #tpu.memory_space<vmem>>, %arg9: memref<1x8xf32, #tpu.memory_space<vmem>>, %arg10: memref<64x8xf32, #tpu.memory_space<vmem>>) attributes {dimension_semantics = [#tpu.dimension_semantics<parallel>], iteration_bounds = array<i64: 2>, scalar_prefetch = 0 : i64, scratch_operands = 0 : i64, tpu.core_type = #tpu.core_type<tc>, window_params = [{transform_indices = @transform_0, window_bounds = array<i64: 64, 32>}, {transform_indices = @transform_1, window_bounds = array<i64: 64, 32>}, {pipeline_mode = #tpu.pipeline_mode<synchronous>, transform_indices = @transform_2, window_bounds = array<i64: 32, 32>}, {pipeline_mode = #tpu.pipeline_mode<synchronous>, transform_indices = @transform_3, window_bounds = array<i64: 1, 32>}, {pipeline_mode = #tpu.pipeline_mode<synchronous>, transform_indices = @transform_4, window_bounds = array<i64: 1, 32>}, {pipeline_mode = #tpu.pipeline_mode<synchronous>, transform_indices = @transform_5, window_bounds = array<i64: 32, 32>}, {pipeline_mode = #tpu.pipeline_mode<synchronous>, transform_indices = @transform_6, window_bounds = array<i64: 1, 32>}, {pipeline_mode = #tpu.pipeline_mode<synchronous>, transform_indices = @transform_7, window_bounds = array<i64: 32, 8>}, {pipeline_mode = #tpu.pipeline_mode<synchronous>, transform_indices = @transform_8, window_bounds = array<i64: 1, 8>}, {transform_indices = @transform_9, window_bounds = array<i64: 64, 8>}]} {
    %c0 = arith.constant 0 : index
    %c0_0 = arith.constant 0 : index
    %0 = vector.load %arg1[%c0, %c0_0] : memref<64x32xf32, #tpu.memory_space<vmem>>, vector<64x32xf32>
    %c0_1 = arith.constant 0 : index
    %c0_2 = arith.constant 0 : index
    %1 = vector.load %arg2[%c0_1, %c0_2] : memref<64x32xf32, #tpu.memory_space<vmem>>, vector<64x32xf32>
    %c0_3 = arith.constant 0 : index
    %c0_4 = arith.constant 0 : index
    %2 = vector.load %arg3[%c0_3, %c0_4] : memref<32x32xf32, #tpu.memory_space<vmem>>, vector<32x32xf32>
    %c0_5 = arith.constant 0 : index
    %c0_6 = arith.constant 0 : index
    %3 = vector.load %arg4[%c0_5, %c0_6] : memref<1x32xf32, #tpu.memory_space<vmem>>, vector<1x32xf32>
    %c0_7 = arith.constant 0 : index
    %c0_8 = arith.constant 0 : index
    %4 = vector.load %arg5[%c0_7, %c0_8] : memref<1x32xf32, #tpu.memory_space<vmem>>, vector<1x32xf32>
    %cst = arith.constant dense<0.000000e+00> : vector<64x32xf32>
    %5 = tpu.matmul %0, %2, %cst {dimension_numbers = #tpu.dot_dimension_numbers<[1], [0], [0], [1], [0, 0, 1, 1], [], []>} : vector<64x32xf32>, vector<32x32xf32>, vector<64x32xf32> -> vector<64x32xf32>
    %6 = vector.broadcast %3 : vector<1x32xf32> to vector<64x32xf32>
    %7 = arith.addf %5, %6 : vector<64x32xf32>
    %8 = math.tanh %7 : vector<64x32xf32>
    %cst_9 = arith.constant dense<0.000000e+00> : vector<64x32xf32>
    %9 = tpu.matmul %1, %2, %cst_9 {dimension_numbers = #tpu.dot_dimension_numbers<[1], [0], [0], [1], [0, 0, 1, 1], [], []>} : vector<64x32xf32>, vector<32x32xf32>, vector<64x32xf32> -> vector<64x32xf32>
    %10 = vector.broadcast %3 : vector<1x32xf32> to vector<64x32xf32>
    %11 = arith.addf %9, %10 : vector<64x32xf32>
    %12 = math.tanh %11 : vector<64x32xf32>
    %13 = vector.broadcast %4 : vector<1x32xf32> to vector<64x32xf32>
    %14 = arith.mulf %8, %13 : vector<64x32xf32>
    %cst_10 = arith.constant dense<0.000000e+00> : vector<64xf32>
    %15 = vector.multi_reduction <add>, %14, %cst_10 [1] : vector<64x32xf32> to vector<64xf32>
    %16 = vector.shape_cast %15 : vector<64xf32> to vector<64x1xf32>
    %17 = vector.broadcast %4 : vector<1x32xf32> to vector<64x32xf32>
    %18 = arith.mulf %12, %17 : vector<64x32xf32>
    %cst_11 = arith.constant dense<0.000000e+00> : vector<64xf32>
    %19 = vector.multi_reduction <add>, %18, %cst_11 [1] : vector<64x32xf32> to vector<64xf32>
    %20 = vector.shape_cast %19 : vector<64xf32> to vector<64x1xf32>
    %21 = arith.maximumf %16, %20 : vector<64x1xf32>
    %22 = arith.subf %16, %21 : vector<64x1xf32>
    %23 = math.exp %22 : vector<64x1xf32>
    %24 = arith.subf %20, %21 : vector<64x1xf32>
    %25 = math.exp %24 : vector<64x1xf32>
    %26 = arith.addf %23, %25 : vector<64x1xf32>
    %cst_12 = arith.constant 1.000000e+00 : f32
    %27 = vector.broadcast %cst_12 : f32 to vector<64x1xf32>
    %28 = arith.divf %27, %26 : vector<64x1xf32>
    %29 = arith.mulf %23, %28 : vector<64x1xf32>
    %30 = vector.broadcast %29 : vector<64x1xf32> to vector<64x32xf32>
    %31 = arith.mulf %30, %0 : vector<64x32xf32>
    %32 = arith.mulf %25, %28 : vector<64x1xf32>
    %33 = vector.broadcast %32 : vector<64x1xf32> to vector<64x32xf32>
    %34 = arith.mulf %33, %1 : vector<64x32xf32>
    %35 = arith.addf %31, %34 : vector<64x32xf32>
    %c0_13 = arith.constant 0 : index
    %c0_14 = arith.constant 0 : index
    %36 = vector.load %arg6[%c0_13, %c0_14] : memref<32x32xf32, #tpu.memory_space<vmem>>, vector<32x32xf32>
    %cst_15 = arith.constant dense<0.000000e+00> : vector<64x32xf32>
    %37 = tpu.matmul %35, %36, %cst_15 {dimension_numbers = #tpu.dot_dimension_numbers<[1], [0], [0], [1], [0, 0, 1, 1], [], []>} : vector<64x32xf32>, vector<32x32xf32>, vector<64x32xf32> -> vector<64x32xf32>
    %c0_16 = arith.constant 0 : index
    %c0_17 = arith.constant 0 : index
    %38 = vector.load %arg7[%c0_16, %c0_17] : memref<1x32xf32, #tpu.memory_space<vmem>>, vector<1x32xf32>
    %39 = vector.broadcast %38 : vector<1x32xf32> to vector<64x32xf32>
    %40 = arith.addf %37, %39 : vector<64x32xf32>
    %cst_18 = arith.constant 0.000000e+00 : f32
    %41 = vector.broadcast %cst_18 : f32 to vector<64x32xf32>
    %42 = arith.maximumf %40, %41 : vector<64x32xf32>
    %c0_19 = arith.constant 0 : index
    %c0_20 = arith.constant 0 : index
    %43 = vector.load %arg8[%c0_19, %c0_20] : memref<32x8xf32, #tpu.memory_space<vmem>>, vector<32x8xf32>
    %cst_21 = arith.constant dense<0.000000e+00> : vector<64x8xf32>
    %44 = tpu.matmul %42, %43, %cst_21 {dimension_numbers = #tpu.dot_dimension_numbers<[1], [0], [0], [1], [0, 0, 1, 1], [], []>} : vector<64x32xf32>, vector<32x8xf32>, vector<64x8xf32> -> vector<64x8xf32>
    %c0_22 = arith.constant 0 : index
    %c0_23 = arith.constant 0 : index
    %45 = vector.load %arg9[%c0_22, %c0_23] : memref<1x8xf32, #tpu.memory_space<vmem>>, vector<1x8xf32>
    %46 = vector.broadcast %45 : vector<1x8xf32> to vector<64x8xf32>
    %47 = arith.addf %44, %46 : vector<64x8xf32>
    %c0_24 = arith.constant 0 : index
    %c0_25 = arith.constant 0 : index
    %48 = vector.load %arg10[%c0_24, %c0_25] : memref<64x8xf32, #tpu.memory_space<vmem>>, vector<64x8xf32>
    tpu.vector_store %arg10[%c0_24, %c0_25], %47 {strides = array<i32>} : memref<64x8xf32, #tpu.memory_space<vmem>>, vector<64x8xf32>,
    return
  }
  func.func @transform_0(%arg0: i32) -> (i32, i32) {
    %c0_i32 = arith.constant 0 : i32
    %c0_i32_0 = arith.constant 0 : i32
    return %arg0, %c0_i32 : i32, i32
  }
  func.func @transform_1(%arg0: i32) -> (i32, i32) {
    %c0_i32 = arith.constant 0 : i32
    %c0_i32_0 = arith.constant 0 : i32
    return %arg0, %c0_i32 : i32, i32
  }
  func.func @transform_2(%arg0: i32) -> (i32, i32) {
    %c0_i32 = arith.constant 0 : i32
    %c0_i32_0 = arith.constant 0 : i32
    %c0_i32_1 = arith.constant 0 : i32
    return %c0_i32, %c0_i32_0 : i32, i32
  }
  func.func @transform_3(%arg0: i32) -> (i32, i32) {
    %c0_i32 = arith.constant 0 : i32
    %c0_i32_0 = arith.constant 0 : i32
    %c0_i32_1 = arith.constant 0 : i32
    return %c0_i32, %c0_i32_0 : i32, i32
  }
  func.func @transform_4(%arg0: i32) -> (i32, i32) {
    %c0_i32 = arith.constant 0 : i32
    %c0_i32_0 = arith.constant 0 : i32
    %c0_i32_1 = arith.constant 0 : i32
    return %c0_i32, %c0_i32_0 : i32, i32
  }
  func.func @transform_5(%arg0: i32) -> (i32, i32) {
    %c0_i32 = arith.constant 0 : i32
    %c0_i32_0 = arith.constant 0 : i32
    %c0_i32_1 = arith.constant 0 : i32
    return %c0_i32, %c0_i32_0 : i32, i32
  }
  func.func @transform_6(%arg0: i32) -> (i32, i32) {
    %c0_i32 = arith.constant 0 : i32
    %c0_i32_0 = arith.constant 0 : i32
    %c0_i32_1 = arith.constant 0 : i32
    return %c0_i32, %c0_i32_0 : i32, i32
  }
  func.func @transform_7(%arg0: i32) -> (i32, i32) {
    %c0_i32 = arith.constant 0 : i32
    %c0_i32_0 = arith.constant 0 : i32
    %c0_i32_1 = arith.constant 0 : i32
    return %c0_i32, %c0_i32_0 : i32, i32
  }
  func.func @transform_8(%arg0: i32) -> (i32, i32) {
    %c0_i32 = arith.constant 0 : i32
    %c0_i32_0 = arith.constant 0 : i32
    %c0_i32_1 = arith.constant 0 : i32
    return %c0_i32, %c0_i32_0 : i32, i32
  }
  func.func @transform_9(%arg0: i32) -> (i32, i32) {
    %c0_i32 = arith.constant 0 : i32
    %c0_i32_0 = arith.constant 0 : i32
    return %arg0, %c0_i32 : i32, i32
  }
}

</mosaic_0001>

<bundles_post_ra>
// kernel: tpu_custom_call.1
= control target key start
LH: loop header
LB: loop body
LE: loop exit
PB: predicated region body
PF: predicated region fallthrough
CT: control target
= control target key end

     0   :  { %s1571_s30 = smov 0   ;;  %s1820_s0 = inlined_call_operand.vmem [shape: f32[128,32], index: 0, kind: input, shape index: {}]   ;;  %s1821_s1 = inlined_call_operand.vmem [shape: f32[128,32], index: 1, kind: input, shape index: {}]   ;;  %s1822_s2 = inlined_call_operand.vmem [shape: f32[32,32], index: 2, kind: input, shape index: {}]   ;;  %s1823_s3 = inlined_call_operand.vmem [shape: f32[1,32], index: 3, kind: input, shape index: {}]   ;;  %s1824_s4 = inlined_call_operand.vmem [shape: f32[1,32], index: 4, kind: input, shape index: {}]   ;;  %s1825_s5 = inlined_call_operand.vmem [shape: f32[32,32], index: 5, kind: input, shape index: {}]   ;;  %s1826_s6 = inlined_call_operand.vmem [shape: f32[1,32], index: 6, kind: input, shape index: {}]   ;;  %s1827_s7 = inlined_call_operand.vmem [shape: f32[32,8], index: 7, kind: input, shape index: {}]   ;;  %s1828_s8 = inlined_call_operand.vmem [shape: f32[1,8], index: 8, kind: input, shape index: {}]   ;;  %s1829_s9 = inlined_call_operand.vmem [shape: f32[128,8], index: 9, kind: output, shape index: {}]  }
   0x1 LB: > { %s1216_s10 = sadd.s32 4294967295, %s1519_s30   ;;  %p1220_p0 = scmp.ge.s32.totalorder %s1519_s30, 1  ;;  %s1519_s30 = sphi %s1571_s30, %s19_s30  }
   0x2   : > { %p299_p1 = scmp.lt.s32.totalorder %s1519_s30, 3 }
   0x4   : > { %p300_p2 = pnand %p1220_p0, %p299_p1 }
   0x5   : > { %v374_v0 = vld [vmem:[%s1822_s2] sm:$0xff] (!%p300_p2)  ;;  %v375_v1 = vld [vmem:[%s1822_s2 + $0x8] sm:$0xff] (!%p300_p2)  ;;  %v376_v2 = vld [vmem:[%s1822_s2 + $0x10] sm:$0xff] (!%p300_p2)  ;;  %s1221_s17 = sshll.u32 (!%p300_p2), %s1216_s10, 3  ;;  %vm386_vm0 = vcmask (!%p300_p2), 261120   ;;  %vm1139_vm1 = vcmask (!%p300_p2), 64512  }
   0x6   : > { %303 = sbr.rel (%p300_p2) target bundleno = 888 (0x378), region = 56  ;;  %v1393_v3 = vpack.c.bf16 (!%p300_p2), %v375_v1, %v374_v0  ;;  %v377_v4 = vld [vmem:[%s1822_s2 + $0x18] sm:$0xff] (!%p300_p2)  ;;  %p341_p3 = scmp.lt.s32.totalorder (!%p300_p2), %s1221_s17, 15  ;;  %v1688_v22 = vld [vmem:[%s1823_s3] ss:$0 sm:$0xff] (!%p300_p2) }
   0x7   : > { %v1397_v5 = vpack.c.bf16 (!%p300_p2), %v377_v4, %v376_v2  ;;  %v1703_v45 = vld [vmem:[%s1824_s4] ss:$0 sm:$0xff] (!%p300_p2) }
   0x8   : > { %1394 = vmatprep.subr.bf16.mxu0 (!%p300_p2), %v1393_v3  ;;  %1402 = vmatprep.subr.bf16.mxu1 (!%p300_p2), %v1393_v3 }
   0x9   : > { %1396 = vmatpush3.bf16.msra.mxu0 (!%p300_p2), %v1393_v3  ;;  %1404 = vmatpush3.bf16.msra.mxu1 (!%p300_p2), %v1393_v3 }
   0xa   : > { %1398 = vmatprep.subr.bf16.mxu0 (!%p300_p2), %v1397_v5  ;;  %1406 = vmatprep.subr.bf16.mxu1 (!%p300_p2), %v1397_v5 }
   0xd   : > { %s1831_s17 = smov (!%p341_p3, %s1221_s17), 15  ;;  %1400 = vmatpush3.bf16.msra.mxu0 %v1397_v5  ;;  %1408 = vmatpush3.bf16.msra.mxu1 %v1397_v5 }
   0xe   : > { %s1591_s20 = sshll.u32 %s1831_s17, 3 }
   0xf   : > { %s1597_s23 = scalar_lea.vmem %s1820_s0, %s1591_s20  ;;  %s1603_s26 = scalar_lea.vmem %s1821_s1, %s1591_s20 }
  0x10   : > { %v1606_v6 = vld [vmem:[%s1597_s23] sm:$0xff]  ;;  %v1614_v8 = vld [vmem:[%s1597_s23 + $0x8] sm:$0xff]  ;;  %v1622_v10 = vld [vmem:[%s1597_s23 + $0x10] sm:$0xff]  ;;  %s356_s14 = scalar_lea.vmem %s1829_s9, %s1591_s20 }
  0x11   : > { %v1609_v7 = vld [vmem:[%s1603_s26] sm:$0xff]  ;;  %1321 = vmatprep.mubr.msk.f32.mxu0 %vm386_vm0, %v1606_v6  ;;  %v1619_v9 = vld [vmem:[%s1603_s26 + $0x8] sm:$0xff]  ;;  %v1625_v11 = vld [vmem:[%s1603_s26 + $0x10] sm:$0xff] }
  0x12   : > { %1341 = vmatprep.mubr.msk.f32.mxu1 %vm386_vm0, %v1609_v7  ;;  %1322 = vmatmul.mubr.msk.f32.vlgmr.msra.gmra.mrb[0].mxu0 %vm386_vm0, %v1614_v8  ;;  %v1634_v12 = vld [vmem:[%s1597_s23 + $0x18] sm:$0xff]  ;;  %v1642_v14 = vld [vmem:[%s1597_s23 + $0x20] sm:$0xff]  ;;  %v1654_v16 = vld [vmem:[%s1597_s23 + $0x28] sm:$0xff] }
  0x13   : > { %1342 = vmatmul.mubr.msk.f32.vlgmr.msra.gmra.mrb[0].mxu1 %vm386_vm0, %v1619_v9  ;;  %1324 = vmatprep.mubr.msk.f32.mxu0 %vm386_vm0, %v1622_v10  ;;  %v1639_v13 = vld [vmem:[%s1603_s26 + $0x18] sm:$0xff]  ;;  %v1645_v15 = vld [vmem:[%s1603_s26 + $0x20] sm:$0xff]  ;;  %v1659_v17 = vld [vmem:[%s1603_s26 + $0x28] sm:$0xff] }
  0x14   : > { %1344 = vmatprep.mubr.msk.f32.mxu1 %vm386_vm0, %v1625_v11  ;;  %v1662_v18 = vld [vmem:[%s1597_s23 + $0x30] sm:$0xff]  ;;  %v1674_v20 = vld [vmem:[%s1597_s23 + $0x38] sm:$0xff] }
  0x15   : > { %v1665_v19 = vld [vmem:[%s1603_s26 + $0x30] sm:$0xff]  ;;  %v1679_v21 = vld [vmem:[%s1603_s26 + $0x38] sm:$0xff] }
  0x16   : > { %1325 = vmatmul.mubr.msk.f32.gmra.mrb[2].mxu0 %vm386_vm0, %v1634_v12 }
  0x17   : > { %1345 = vmatmul.mubr.msk.f32.gmra.mrb[2].mxu1 %vm386_vm0, %v1639_v13  ;;  %1327 = vmatprep.mubr.msk.f32.mxu0 %vm386_vm0, %v1642_v14 }
  0x18   : > { %1347 = vmatprep.mubr.msk.f32.mxu1 %vm386_vm0, %v1645_v15 }
  0x1a   : > { %1328 = vmatmul.mubr.msk.f32.gmra.mrb[4].mxu0 %vm386_vm0, %v1654_v16 }
  0x1b   : > { %1348 = vmatmul.mubr.msk.f32.gmra.mrb[4].mxu1 %vm386_vm0, %v1659_v17  ;;  %1330 = vmatprep.mubr.msk.f32.mxu0 %vm386_vm0, %v1662_v18 }
  0x1c   : > { %1350 = vmatprep.mubr.msk.f32.mxu1 %vm386_vm0, %v1665_v19 }
  0x1e   : > { %1331 = vmatmul.mubr.msk.f32.gmra.mrb[6].mxu0 %vm386_vm0, %v1674_v20 }
  0x1f   : > { %1351 = vmatmul.mubr.msk.f32.gmra.mrb[6].mxu1 %vm386_vm0, %v1679_v21 }
  0xe5   : > { %v1323_v23 = vpop.f32.mrb[0].mxu0 }
  0xe6   : > { %v483_v24 = vadd.f32 %v1323_v23, %v1688_v22  ;;  %v477_v25 = vpop.f32.mrb[1].mxu0  ;;  %v1343_v26 = vpop.f32.mrb[0].mxu1 }
  0xe7   : > { %v478_v27 = vadd.f32 %v1688_v22, %v477_v25  ;;  %v620_v28 = vadd.f32 %v1343_v26, %v1688_v22  ;;  %v614_v29 = vpop.f32.mrb[1].mxu1 }
  0xe8   : > { %1433 = vtanh.f32 %v483_v24  ;;  %v615_v30 = vadd.f32 %v1688_v22, %v614_v29 }
  0xe9   : > { %1435 = vtanh.f32 %v478_v27  ;;  %v1326_v31 = vpop.f32.mrb[2].mxu0 }
  0xea   : > { %1437 = vtanh.f32 %v620_v28  ;;  %v493_v32 = vadd.f32 %v1326_v31, %v1688_v22  ;;  %v1346_v33 = vpop.f32.mrb[2].mxu1  ;;  %v487_v34 = vpop.f32.mrb[3].mxu0 }
  0xeb   : > { %1439 = vtanh.f32 %v615_v30  ;;  %v630_v35 = vadd.f32 %v1346_v33, %v1688_v22  ;;  %v624_v36 = vpop.f32.mrb[3].mxu1  ;;  %v488_v38 = vadd.f32 %v1688_v22, %v487_v34 }
  0xec   : > { %1441 = vtanh.f32 %v493_v32  ;;  %v625_v37 = vadd.f32 %v1688_v22, %v624_v36 }
  0xed   : > { %1443 = vtanh.f32 %v630_v35  ;;  %v1329_v39 = vpop.f32.mrb[4].mxu0 }
  0xee   : > { %v1349_v40 = vpop.f32.mrb[4].mxu1  ;;  %v497_v41 = vpop.f32.mrb[5].mxu0  ;;  %v503_v42 = vadd.f32 %v1329_v39, %v1688_v22  ;;  %1445 = vtanh.f32 %v625_v37 }
  0xef   : > { %v640_v43 = vadd.f32 %v1349_v40, %v1688_v22  ;;  %v634_v44 = vpop.f32.mrb[5].mxu1  ;;  %1447 = vtanh.f32 %v488_v38  ;;  %v498_v58 = vadd.f32 %v1688_v22, %v497_v41 }
  0xf0   : > { %v635_v54 = vadd.f32 %v1688_v22, %v634_v44 }
  0xf1   : > { %v1332_v46 = vpop.f32.mrb[6].mxu0  ;;  %1449 = vtanh.f32 %v640_v43 }
  0xf2   : > { %v1434_v47 = vpop.eup %1433  ;;  %v1352_v48 = vpop.f32.mrb[6].mxu1  ;;  %1451 = vtanh.f32 %v503_v42  ;;  %v513_v30 = vadd.f32 %v1332_v46, %v1688_v22 }
  0xf3   : > { %v507_v49 = vpop.f32.mrb[7].mxu0  ;;  %v1436_v50 = vpop.eup %1435  ;;  %v668_v51 = vmul.f32 %v1434_v47, %v1703_v45  ;;  %1453 = vtanh.f32 %v635_v54  ;;  %v650_v27 = vadd.f32 %v1352_v48, %v1688_v22 }
  0xf4   : > { %v644_v52 = vpop.f32.mrb[7].mxu1  ;;  %v1438_v53 = vpop.eup %1437  ;;  %v667_v55 = vmul.f32 %v1436_v50, %v1703_v45  ;;  %v508_v2 = vadd.f32 %v1688_v22, %v507_v49  ;;  %1455 = vtanh.f32 %v498_v58  ;;  %v852_v58 = vld [vmem:[%s1825_s5 + $0x8] sm:$0xff] }
  0xf5   : > { %v1440_v56 = vpop.eup %1439  ;;  %v678_v57 = vsel %vm386_vm0, %v668_v51, 0.0  ;;  %v700_v59 = vmul.f32 %v1438_v53, %v1703_v45  ;;  %v645_v63 = vadd.f32 %v1688_v22, %v644_v52 }
  0xf6   : > { %v1442_v60 = vpop.eup %1441  ;;  %679 = vadd.xlane.f32.xlu1 %v678_v57  ;;  %v675_v61 = vsel %vm386_vm0, %v667_v55, 0.0  ;;  %v699_v62 = vmul.f32 %v1440_v56, %v1703_v45  ;;  %v851_v57 = vld [vmem:[%s1825_s5] sm:$0xff] }
  0xf7   : > { %v1444_v0 = vpop.eup %1443  ;;  %676 = vadd.xlane.f32.xlu0 %v675_v61  ;;  %v710_v1 = vsel %vm386_vm0, %v700_v59, 0.0  ;;  %v670_v5 = vmul.f32 %v1442_v60, %v1703_v45  ;;  %1457 = vtanh.f32 %v645_v63  ;;  %v1409_v59 = vpack.c.bf16 %v852_v58, %v851_v57  ;;  %v854_v60 = vld [vmem:[%s1825_s5 + $0x18] sm:$0xff]  ;;  %v1000_v63 = vld [vmem:[%s1827_s7 + $0x8] sm:$0xff] }
  0xf8   : > { %v707_v3 = vsel %vm386_vm0, %v699_v62, 0.0  ;;  %v702_v4 = vmul.f32 %v1444_v0, %v1703_v45  ;;  %v1446_v23 = vpop.eup %1445  ;;  %1459 = vtanh.f32 %v508_v2  ;;  %v999_v62 = vld [vmem:[%s1827_s7] sm:$0xff] }
  0xf9   : > { %v1448_v24 = vpop.eup %1447  ;;  %v684_v28 = vsel %vm386_vm0, %v670_v5, 0.0  ;;  %v701_v31 = vmul.f32 %v1446_v23, %v1703_v45  ;;  %1461 = vtanh.f32 %v650_v27  ;;  %1410 = vmatprep.subr.bf16.mxu0 %v1409_v59  ;;  %v1417_v0 = vpack.c.bf16 %v1000_v63, %v999_v62 }
  0xfa   : > { %711 = vadd.xlane.f32.xlu1 %v710_v1  ;;  %v716_v25 = vsel %vm386_vm0, %v702_v4, 0.0  ;;  %v669_v32 = vmul.f32 %v1448_v24, %v1703_v45  ;;  %1463 = vtanh.f32 %v513_v30  ;;  %1412 = vmatpush3.bf16.msra.mxu0 %v1409_v59 }
  0xfb   : > { %708 = vadd.xlane.f32.xlu0 %v707_v3  ;;  %v1450_v26 = vpop.eup %1449  ;;  %v713_v35 = vsel %vm386_vm0, %v701_v31, 0.0  ;;  %1418 = vmatprep.subr.bf16.mxu1 %v1417_v0 }
  0xfc   : > { %v1452_v29 = vpop.eup %1451  ;;  %v704_v33 = vmul.f32 %v1450_v26, %v1703_v45  ;;  %v681_v37 = vsel %vm386_vm0, %v669_v32, 0.0  ;;  %1420 = vmatpush3.bf16.msra.mxu1 %v1417_v0 }
  0xfd   : > { %v672_v34 = vmul.f32 %v1452_v29, %v1703_v45  ;;  %v1454_v36 = vpop.eup %1453 }
  0xfe   : > { %717 = vadd.xlane.f32.xlu1 %v716_v25  ;;  %v1456_v38 = vpop.eup %1455  ;;  %v722_v22 = vsel %vm386_vm0, %v704_v33, 0.0  ;;  %v703_v42 = vmul.f32 %v1454_v36, %v1703_v45 }
  0xff   : > { %685 = vadd.xlane.f32.xlu0 %v684_v28  ;;  %v690_v40 = vsel %vm386_vm0, %v672_v34, 0.0  ;;  %v671_v43 = vmul.f32 %v1456_v38, %v1703_v45 }
 0x100   : > { %v719_v47 = vsel %vm386_vm0, %v703_v42, 0.0 }
 0x101   : > { %v1458_v39 = vpop.eup %1457  ;;  %v687_v49 = vsel %vm386_vm0, %v671_v43, 0.0 }
 0x102   : > { %714 = vadd.xlane.f32.xlu1 %v713_v35  ;;  %v1460_v41 = vpop.eup %1459  ;;  %v705_v44 = vmul.f32 %v1458_v39, %v1703_v45 }
 0x103   : > { %682 = vadd.xlane.f32.xlu0 %v681_v37  ;;  %v673_v46 = vmul.f32 %v1460_v41, %v1703_v45  ;;  %v1462_v48 = vpop.eup %1461 }
 0x104   : > { %v1464_v50 = vpop.eup %1463  ;;  %v725_v51 = vsel %vm386_vm0, %v705_v44, 0.0  ;;  %v706_v53 = vmul.f32 %v1462_v48, %v1703_v45 }
 0x105   : > { %v693_v52 = vsel %vm386_vm0, %v673_v46, 0.0  ;;  %v674_v54 = vmul.f32 %v1464_v50, %v1703_v45  ;;  %v853_v45 = vld [vmem:[%s1825_s5 + $0x10] sm:$0xff] }
 0x106   : > { %723 = vadd.xlane.f32.xlu1 %v722_v22  ;;  %v728_v55 = vsel %vm386_vm0, %v706_v53, 0.0  ;;  %v1413_v61 = vpack.c.bf16 %v854_v60, %v853_v45 }
 0x107   : > { %691 = vadd.xlane.f32.xlu0 %v690_v40  ;;  %v696_v56 = vsel %vm386_vm0, %v674_v54, 0.0 }
 0x108   : > { %1414 = vmatprep.subr.bf16.mxu0 %v1413_v61 }
 0x109   : > { %1416 = vmatpush3.bf16.msra.mxu0 %v1413_v61 }
 0x10a   : > { %720 = vadd.xlane.f32.xlu1 %v719_v47 }
 0x10b   : > { %688 = vadd.xlane.f32.xlu0 %v687_v49 }
 0x10e   : > { %726 = vadd.xlane.f32.xlu1 %v725_v51 }
 0x10f   : > { %694 = vadd.xlane.f32.xlu0 %v693_v52 }
 0x112   : > { %729 = vadd.xlane.f32.xlu1 %v728_v55 }
 0x113   : > { %697 = vadd.xlane.f32.xlu0 %v696_v56 }
 0x183   : > { %v680_v1 = vpop.xlane.xlu1 %679 }
 0x184   : > { %v677_v2 = vpop.xlane.xlu0 %676 }
 0x187   : > { %v712_v3 = vpop.xlane.xlu1 %711 }
 0x188   : > { %v732_v4 = vmax.f32 %v680_v1, %v712_v3  ;;  %v709_v5 = vpop.xlane.xlu0 %708 }
 0x189   : > { %v731_v23 = vmax.f32 %v677_v2, %v709_v5 }
 0x18a   : > { %v740_v24 = vsub.f32 %v680_v1, %v732_v4  ;;  %v764_v25 = vsub.f32 %v712_v3, %v732_v4 }
 0x18b   : > { %v739_v26 = vsub.f32 %v677_v2, %v731_v23  ;;  %v763_v27 = vsub.f32 %v709_v5, %v731_v23  ;;  %v718_v28 = vpop.xlane.xlu1 %717 }
 0x18c   : > { %v749_v29 = vmul.f32 1.442695, %v740_v24  ;;  %v773_v30 = vmul.f32 1.442695, %v764_v25  ;;  %v686_v31 = vpop.xlane.xlu0 %685 }
 0x18d   : > { %v747_v32 = vmul.f32 1.442695, %v739_v26  ;;  %v771_v33 = vmul.f32 1.442695, %v763_v27  ;;  %v734_v34 = vmax.f32 %v686_v31, %v718_v28 }
 0x18e   : > { %1465 = vpow2.f32 %v749_v29 }
 0x18f   : > { %1467 = vpow2.f32 %v773_v30  ;;  %v742_v35 = vsub.f32 %v686_v31, %v734_v34  ;;  %v766_v36 = vsub.f32 %v718_v28, %v734_v34  ;;  %v715_v37 = vpop.xlane.xlu1 %714 }
 0x190   : > { %1469 = vpow2.f32 %v747_v32  ;;  %v683_v38 = vpop.xlane.xlu0 %682 }
 0x191   : > { %1471 = vpow2.f32 %v771_v33  ;;  %v753_v22 = vmul.f32 1.442695, %v742_v35  ;;  %v777_v39 = vmul.f32 1.442695, %v766_v36  ;;  %v733_v40 = vmax.f32 %v683_v38, %v715_v37 }
 0x193   : > { %1473 = vpow2.f32 %v753_v22  ;;  %v741_v41 = vsub.f32 %v683_v38, %v733_v40  ;;  %v765_v42 = vsub.f32 %v715_v37, %v733_v40  ;;  %v724_v43 = vpop.xlane.xlu1 %723 }
 0x194   : > { %1475 = vpow2.f32 %v777_v39  ;;  %v692_v44 = vpop.xlane.xlu0 %691 }
 0x195   : > { %v751_v46 = vmul.f32 1.442695, %v741_v41  ;;  %v775_v47 = vmul.f32 1.442695, %v765_v42  ;;  %v736_v48 = vmax.f32 %v692_v44, %v724_v43 }
 0x197   : > { %1477 = vpow2.f32 %v751_v46  ;;  %v744_v49 = vsub.f32 %v692_v44, %v736_v48  ;;  %v768_v50 = vsub.f32 %v724_v43, %v736_v48  ;;  %v721_v51 = vpop.xlane.xlu1 %720 }
 0x198   : > { %v1466_v52 = vpop.eup %1465  ;;  %1479 = vpow2.f32 %v775_v47  ;;  %v689_v53 = vpop.xlane.xlu0 %688 }
 0x199   : > { %v1468_v54 = vpop.eup %1467  ;;  %v757_v55 = vmul.f32 1.442695, %v744_v49  ;;  %v781_v56 = vmul.f32 1.442695, %v768_v50  ;;  %v735_v57 = vmax.f32 %v689_v53, %v721_v51 }
 0x19a   : > { %v1470_v58 = vpop.eup %1469  ;;  %v788_v59 = vadd.f32 %v1468_v54, %v1466_v52 }
 0x19b   : > { %v1472_v45 = vpop.eup %1471  ;;  %1481 = vpow2.f32 %v757_v55  ;;  %v743_v60 = vsub.f32 %v689_v53, %v735_v57  ;;  %v767_v61 = vsub.f32 %v721_v51, %v735_v57  ;;  %v727_v62 = vpop.xlane.xlu1 %726 }
 0x19c   : > { %1483 = vrcp.f32 %v788_v59  ;;  %v787_v63 = vadd.f32 %v1472_v45, %v1470_v58  ;;  %v695_v0 = vpop.xlane.xlu0 %694 }
 0x19d   : > { %v1474_v1 = vpop.eup %1473  ;;  %1485 = vpow2.f32 %v781_v56  ;;  %v755_v2 = vmul.f32 1.442695, %v743_v60  ;;  %v779_v3 = vmul.f32 1.442695, %v767_v61  ;;  %v737_v4 = vmax.f32 %v695_v0, %v727_v62 }
 0x19e   : > { %v1476_v5 = vpop.eup %1475  ;;  %1487 = vrcp.f32 %v787_v63 }
 0x19f   : > { %v790_v23 = vadd.f32 %v1476_v5, %v1474_v1  ;;  %1489 = vpow2.f32 %v755_v2  ;;  %v745_v24 = vsub.f32 %v695_v0, %v737_v4  ;;  %v769_v25 = vsub.f32 %v727_v62, %v737_v4  ;;  %v730_v26 = vpop.xlane.xlu1 %729 }
 0x1a0   : > { %1491 = vpow2.f32 %v779_v3  ;;  %v698_v27 = vpop.xlane.xlu0 %697 }
 0x1a1   : > { %v1478_v28 = vpop.eup %1477  ;;  %1493 = vrcp.f32 %v790_v23  ;;  %v759_v29 = vmul.f32 1.442695, %v745_v24  ;;  %v783_v30 = vmul.f32 1.442695, %v769_v25  ;;  %v738_v31 = vmax.f32 %v698_v27, %v730_v26 }
 0x1a2   : > { %v1480_v32 = vpop.eup %1479 }
 0x1a3   : > { %v789_v33 = vadd.f32 %v1480_v32, %v1478_v28  ;;  %1495 = vpow2.f32 %v759_v29  ;;  %v746_v34 = vsub.f32 %v698_v27, %v738_v31  ;;  %v770_v35 = vsub.f32 %v730_v26, %v738_v31 }
 0x1a4   : > { %1497 = vpow2.f32 %v783_v30 }
 0x1a5   : > { %v1482_v36 = vpop.eup %1481  ;;  %1499 = vrcp.f32 %v789_v33  ;;  %v761_v37 = vmul.f32 1.442695, %v746_v34  ;;  %v785_v38 = vmul.f32 1.442695, %v770_v35 }
 0x1a6   : > { %v1484_v22 = vpop.eup %1483 }
 0x1a7   : > { %v1486_v39 = vpop.eup %1485  ;;  %v812_v40 = vmul.f32 %v1484_v22, %v1466_v52  ;;  %v828_v41 = vmul.f32 %v1484_v22, %v1468_v54  ;;  %1501 = vpow2.f32 %v761_v37 }
 0x1a8   : > { %v1488_v42 = vpop.eup %1487  ;;  %v792_v43 = vadd.f32 %v1486_v39, %v1482_v36  ;;  %1503 = vpow2.f32 %v785_v38 }
 0x1a9   : > { %v1490_v44 = vpop.eup %1489  ;;  %v811_v46 = vmul.f32 %v1488_v42, %v1470_v58  ;;  %v827_v47 = vmul.f32 %v1488_v42, %v1472_v45  ;;  %v820_v49 = vmul.f32 %v812_v40, %v1614_v8  ;;  %v836_v50 = vmul.f32 %v828_v41, %v1619_v9 }
 0x1aa   : > { %v1492_v48 = vpop.eup %1491  ;;  %1505 = vrcp.f32 %v792_v43 }
 0x1ab   : > { %v1494_v51 = vpop.eup %1493  ;;  %v791_v53 = vadd.f32 %v1492_v48, %v1490_v44  ;;  %v819_v55 = vmul.f32 %v811_v46, %v1606_v6  ;;  %v835_v52 = vmul.f32 %v827_v47, %v1609_v7  ;;  %v844_v58 = vadd.f32 %v836_v50, %v820_v49 }
 0x1ac   : > { %v814_v57 = vmul.f32 %v1494_v51, %v1474_v1  ;;  %v830_v59 = vmul.f32 %v1494_v51, %v1476_v5 }
 0x1ad   : > { %v1496_v54 = vpop.eup %1495  ;;  %1507 = vrcp.f32 %v791_v53  ;;  %v843_v56 = vadd.f32 %v835_v52, %v819_v55 }
 0x1ae   : > { %v1498_v60 = vpop.eup %1497  ;;  %v822_v6 = vmul.f32 %v814_v57, %v1634_v12  ;;  %v838_v7 = vmul.f32 %v830_v59, %v1639_v13 }
 0x1af   : > { %v1500_v45 = vpop.eup %1499  ;;  %v793_v61 = vadd.f32 %v1498_v60, %v1496_v54  ;;  %1361 = vmatprep.mubr.msk.f32.mxu0 %vm386_vm0, %v843_v56 }
 0x1b0   : > { %1362 = vmatmul.mubr.msk.f32.vlgmr.msra.gmra.mrb[8].mxu0 %vm386_vm0, %v844_v58  ;;  %v813_v8 = vmul.f32 %v1500_v45, %v1478_v28  ;;  %v829_v9 = vmul.f32 %v1500_v45, %v1480_v32  ;;  %v846_v5 = vadd.f32 %v838_v7, %v822_v6 }
 0x1b1   : > { %v1502_v62 = vpop.eup %1501  ;;  %1509 = vrcp.f32 %v793_v61  ;;  %v1254_v61 = vld [vmem:[%s1828_s8] ss:$0 sm:$0xff] }
 0x1b2   : > { %v1504_v63 = vpop.eup %1503  ;;  %v821_v0 = vmul.f32 %v813_v8, %v1622_v10  ;;  %v837_v1 = vmul.f32 %v829_v9, %v1625_v11 }
 0x1b3   : > { %v794_v2 = vadd.f32 %v1504_v63, %v1502_v62 }
 0x1b4   : > { %v1506_v3 = vpop.eup %1505  ;;  %v845_v4 = vadd.f32 %v837_v1, %v821_v0 }
 0x1b5   : > { %1511 = vrcp.f32 %v794_v2  ;;  %v816_v23 = vmul.f32 %v1506_v3, %v1482_v36  ;;  %v832_v24 = vmul.f32 %v1506_v3, %v1486_v39 }
 0x1b6   : > { %1364 = vmatprep.mubr.msk.f32.mxu0 %vm386_vm0, %v845_v4 }
 0x1b7   : > { %v1508_v25 = vpop.eup %1507  ;;  %1365 = vmatmul.mubr.msk.f32.gmra.mrb[10].mxu0 %vm386_vm0, %v846_v5  ;;  %v824_v13 = vmul.f32 %v816_v23, %v1654_v16  ;;  %v840_v10 = vmul.f32 %v832_v24, %v1659_v17 }
 0x1b8   : > { %v815_v12 = vmul.f32 %v1508_v25, %v1490_v44  ;;  %v831_v26 = vmul.f32 %v1508_v25, %v1492_v48 }
 0x1b9   : > { %v848_v32 = vadd.f32 %v840_v10, %v824_v13 }
 0x1ba   : > { %v823_v11 = vmul.f32 %v815_v12, %v1642_v14  ;;  %v839_v27 = vmul.f32 %v831_v26, %v1645_v15 }
 0x1bb   : > { %v1510_v28 = vpop.eup %1509 }
 0x1bc   : > { %v847_v29 = vadd.f32 %v839_v27, %v823_v11  ;;  %v817_v30 = vmul.f32 %v1510_v28, %v1496_v54  ;;  %v833_v31 = vmul.f32 %v1510_v28, %v1498_v60 }
 0x1be   : > { %1367 = vmatprep.mubr.msk.f32.mxu0 %vm386_vm0, %v847_v29  ;;  %v825_v33 = vmul.f32 %v817_v30, %v1662_v18  ;;  %v841_v34 = vmul.f32 %v833_v31, %v1665_v19  ;;  %v1001_v18 = vld [vmem:[%s1827_s7 + $0x10] sm:$0xff]  ;;  %v1002_v19 = vld [vmem:[%s1827_s7 + $0x18] sm:$0xff] }
 0x1bf   : > { %v1512_v35 = vpop.eup %1511  ;;  %1368 = vmatmul.mubr.msk.f32.gmra.mrb[12].mxu0 %vm386_vm0, %v848_v32  ;;  %v1421_v38 = vpack.c.bf16 %v1002_v19, %v1001_v18 }
 0x1c0   : > { %v849_v16 = vadd.f32 %v841_v34, %v825_v33  ;;  %v818_v17 = vmul.f32 %v1512_v35, %v1502_v62  ;;  %v834_v36 = vmul.f32 %v1512_v35, %v1504_v63 }
 0x1c1   : > { %1422 = vmatprep.subr.bf16.mxu1 %v1421_v38 }
 0x1c2   : > { %1370 = vmatprep.mubr.msk.f32.mxu0 %vm386_vm0, %v849_v16  ;;  %v826_v14 = vmul.f32 %v818_v17, %v1674_v20  ;;  %v842_v15 = vmul.f32 %v834_v36, %v1679_v21  ;;  %1424 = vmatpush3.bf16.msra.mxu1 %v1421_v38  ;;  %v1245_v20 = vld [vmem:[%s1826_s6] ss:$0 sm:$0xff] }
 0x1c4   : > { %v850_v37 = vadd.f32 %v842_v15, %v826_v14 }
 0x1c6   : > { %1371 = vmatmul.mubr.msk.f32.gmra.mrb[14].mxu0 %vm386_vm0, %v850_v37 }
 0x283   : > { %v1363_v22 = vpop.f32.mrb[8].mxu0 }
 0x284   : > { %v958_v21 = vadd.f32 %v1363_v22, %v1245_v20  ;;  %v952_v39 = vpop.f32.mrb[9].mxu0 }
 0x285   : > { %v953_v40 = vadd.f32 %v1245_v20, %v952_v39 }
 0x286   : > { %v992_v42 = vmax.f32 %v958_v21, 0.0 }
 0x287   : > { %v991_v41 = vmax.f32 %v953_v40, 0.0 }
 0x289   : > { %1381 = vmatprep.mubr.msk.f32.mxu1 %vm386_vm0, %v991_v41 }
 0x28a   : > { %1382 = vmatmul.mubr.msk.f32.vlgmr.msra.gmra.mrb[8].mxu1 %vm386_vm0, %v992_v42  ;;  %v1366_v43 = vpop.f32.mrb[10].mxu0 }
 0x28b   : > { %v968_v44 = vadd.f32 %v1366_v43, %v1245_v20  ;;  %v962_v46 = vpop.f32.mrb[11].mxu0 }
 0x28c   : > { %v963_v47 = vadd.f32 %v1245_v20, %v962_v46 }
 0x28d   : > { %v994_v49 = vmax.f32 %v968_v44, 0.0 }
 0x28e   : > { %v993_v48 = vmax.f32 %v963_v47, 0.0 }
 0x290   : > { %1384 = vmatprep.mubr.msk.f32.mxu1 %vm386_vm0, %v993_v48 }
 0x291   : > { %1385 = vmatmul.mubr.msk.f32.gmra.mrb[10].mxu1 %vm386_vm0, %v994_v49 }
 0x292   : > { %v1369_v50 = vpop.f32.mrb[12].mxu0 }
 0x293   : > { %v978_v51 = vadd.f32 %v1369_v50, %v1245_v20  ;;  %v972_v53 = vpop.f32.mrb[13].mxu0 }
 0x294   : > { %v973_v55 = vadd.f32 %v1245_v20, %v972_v53 }
 0x295   : > { %v996_v54 = vmax.f32 %v978_v51, 0.0 }
 0x296   : > { %v995_v52 = vmax.f32 %v973_v55, 0.0 }
 0x298   : > { %1387 = vmatprep.mubr.msk.f32.mxu1 %vm386_vm0, %v995_v52 }
 0x299   : > { %v1372_v56 = vpop.f32.mrb[14].mxu0  ;;  %1388 = vmatmul.mubr.msk.f32.gmra.mrb[12].mxu1 %vm386_vm0, %v996_v54 }
 0x29a   : > { %v988_v57 = vadd.f32 %v1372_v56, %v1245_v20  ;;  %v982_v59 = vpop.f32.mrb[15].mxu0 }
 0x29b   : > { %v983_v60 = vadd.f32 %v1245_v20, %v982_v59 }
 0x29c   : > { %v998_v45 = vmax.f32 %v988_v57, 0.0 }
 0x29d   : > { %v997_v58 = vmax.f32 %v983_v60, 0.0 }
 0x29f   : > { %1390 = vmatprep.mubr.msk.f32.mxu1 %vm386_vm0, %v997_v58 }
 0x2a0   : > { %1391 = vmatmul.mubr.msk.f32.gmra.mrb[14].mxu1 %vm386_vm0, %v998_v45 }
 0x35d   : > { %v1383_v8 = vpop.f32.mrb[8].mxu1 }
 0x35e   : > { %v1106_v9 = vadd.f32 %v1383_v8, %v1254_v61  ;;  %v1100_v62 = vpop.f32.mrb[9].mxu1 }
 0x35f   : > { %v1101_v6 = vadd.f32 %v1254_v61, %v1100_v62 }
 0x360   : > { %1141 = vst.msk [vmem:[%s356_s14 + $0x8] sm:$0xff] %vm1139_vm1, %v1106_v9 }
 0x361   : > { %1140 = vst.msk [vmem:[%s356_s14] sm:$0xff] %vm1139_vm1, %v1101_v6 }
 0x364   : > { %v1386_v7 = vpop.f32.mrb[10].mxu1 }
 0x365   : > { %v1116_v63 = vadd.f32 %v1386_v7, %v1254_v61  ;;  %v1110_v0 = vpop.f32.mrb[11].mxu1 }
 0x366   : > { %v1111_v1 = vadd.f32 %v1254_v61, %v1110_v0 }
 0x367   : > { %1143 = vst.msk [vmem:[%s356_s14 + $0x18] sm:$0xff] %vm1139_vm1, %v1116_v63 }
 0x368   : > { %1142 = vst.msk [vmem:[%s356_s14 + $0x10] sm:$0xff] %vm1139_vm1, %v1111_v1 }
 0x36c   : > { %v1389_v2 = vpop.f32.mrb[12].mxu1 }
 0x36d   : > { %v1126_v3 = vadd.f32 %v1389_v2, %v1254_v61  ;;  %v1120_v4 = vpop.f32.mrb[13].mxu1 }
 0x36e   : > { %v1121_v5 = vadd.f32 %v1254_v61, %v1120_v4 }
 0x36f   : > { %1145 = vst.msk [vmem:[%s356_s14 + $0x28] sm:$0xff] %vm1139_vm1, %v1126_v3 }
 0x370   : > { %1144 = vst.msk [vmem:[%s356_s14 + $0x20] sm:$0xff] %vm1139_vm1, %v1121_v5 }
 0x373   : > { %v1392_v23 = vpop.f32.mrb[14].mxu1 }
 0x374   : > { %v1136_v24 = vadd.f32 %v1392_v23, %v1254_v61  ;;  %v1130_v25 = vpop.f32.mrb[15].mxu1 }
 0x375   : > { %v1131_v12 = vadd.f32 %v1254_v61, %v1130_v25 }
 0x376   : > { %1147 = vst.msk [vmem:[%s356_s14 + $0x38] sm:$0xff] %vm1139_vm1, %v1136_v24 }
 0x377   : > { %1146 = vst.msk [vmem:[%s356_s14 + $0x30] sm:$0xff] %vm1139_vm1, %v1131_v12 }
 0x378 PF: > { %s19_s30 = sadd.s32 1, %s1519_s30  }
 0x379   : > { %p16_p4 = scmp.ge.s32.totalorder %s19_s30, 4  }
 0x37b   :  { %18 = sbr.rel (!%p16_p4) target bundleno = 1 (0x1), region = 89 }

</bundles_post_ra>
